<compile_context>
chip_gen: v7x
topology: tpu7x:2x2x1
jax: 0.10.0
libtpu: 0.0.40
codegen_flags: <defaults>
</compile_context>

<pallas_src>
import numpy as np
import jax
import jax.numpy as jnp
from jax.experimental import pallas as pl
from jax.experimental.pallas import tpu as pltpu


# ----------------------------- kernels -------------------------------------


def _drop_path_kernel(scale_ref, x_ref, o_ref):
    # scale_ref: (tb, 1) f32 per-sample keep/keep_prob; broadcast over lanes.
    xf = x_ref[...].astype(jnp.float32)
    o_ref[...] = (xf * scale_ref[...]).astype(o_ref.dtype)


def _drop_path_add_kernel(scale_ref, x_ref, r_ref, o_ref):
    # Fused residual add: out = residual + scale * x (one HBM pass saved).
    xf = x_ref[...].astype(jnp.float32)
    rf = r_ref[...].astype(jnp.float32)
    o_ref[...] = (rf + xf * scale_ref[...]).astype(o_ref.dtype)


# --------------------------- tiling / launch --------------------------------


def _tile_plan(batch, feat, itemsize, max_tb, max_block_bytes):
    """Pick (tb, tf) blocks: sublane-unit aligned tb, 128-aligned lane-dense tf."""
    sub = max(8, 32 // max(1, itemsize))  # 8 for f32, 16 for bf16, 32 for int8/fp8
    if batch < sub:
        tb = batch  # full-extent block (allowed by the (8,128) rule)
    else:
        tb = max(sub, min(max_tb // sub, batch // sub) * sub)

    if feat < 128:
        tf = feat  # full-extent block; unavoidable for tiny feature dims
    else:
        cap_lanes = max(128, (max_block_bytes // (tb * itemsize)) // 128 * 128)
        tf = min((feat // 128) * 128, cap_lanes)
    return tb, tf


def _vmem_limit_bytes(block_bytes, n_big_streams):
    # double-buffered big inputs/outputs + headroom, capped for v7x's 64 MiB VMEM
    need = 2 * n_big_streams * block_bytes + (2 << 20)
    return int(min(48 << 20, max(16 << 20, need)))


def _launch(kernel, scale, big_arrays, out_dtype, max_tb, max_block_bytes):
    B, N = big_arrays[0].shape
    itemsize = jnp.dtype(big_arrays[0].dtype).itemsize
    tb, tf = _tile_plan(B, N, itemsize, max_tb, max_block_bytes)
    grid = (pl.cdiv(B, tb), pl.cdiv(N, tf))
    block_bytes = tb * tf * itemsize

    big_spec = pl.BlockSpec((tb, tf), lambda i, j: (i, j))
    scale_spec = pl.BlockSpec((tb, 1), lambda i, j: (i, 0))

    return pl.pallas_call(
        kernel,
        out_shape=jax.ShapeDtypeStruct((B, N), out_dtype),
        grid=grid,
        in_specs=[scale_spec] + [big_spec] * len(big_arrays),
        out_specs=big_spec,
        compiler_params=pltpu.CompilerParams(
            dimension_semantics=("parallel", "parallel"),
            vmem_limit_bytes=_vmem_limit_bytes(block_bytes, len(big_arrays) + 1),
        ),
    )(scale, *big_arrays)


# ------------------------------ wrappers ------------------------------------


def _keep_scale(key, batch, drop_prob, keep_prob):
    # torch: floor(keep_prob + U[0,1)) == 1  <=>  U >= drop_prob
    u = jax.random.uniform(key, (batch, 1), dtype=jnp.float32)
    keep = (u >= jnp.float32(drop_prob)).astype(jnp.float32)
    return keep * jnp.float32(1.0 / keep_prob)


def drop_path_pallas(x, drop_prob: float, *, key=None, seed: int = 0,
                     training: bool = False, max_tb: int = 256,
                     max_block_bytes: int = 4 << 20):
    """Pallas TPU equivalent of torch drop_path(x, drop_prob, training)."""
    if drop_prob == 0.0 or not training:
        return x
    assert 0.0 < drop_prob < 1.0, drop_prob
    keep_prob = 1.0 - drop_prob
    if key is None:
        key = jax.random.PRNGKey(seed)

    B = x.shape[0]
    N = int(np.prod(x.shape[1:])) if x.ndim > 1 else 1
    scale = _keep_scale(key, B, drop_prob, keep_prob)
    out = _launch(_drop_path_kernel, scale, [x.reshape(B, N)], x.dtype,
                  max_tb, max_block_bytes)
    return out.reshape(x.shape)


def drop_path_add_pallas(residual, x, drop_prob: float, *, key=None,
                         seed: int = 0, training: bool = False,
                         max_tb: int = 256, max_block_bytes: int = 4 << 20):
    """Fused `residual + drop_path(x)` (saves one HBM round-trip)."""
    assert residual.shape == x.shape, (residual.shape, x.shape)
    if drop_prob == 0.0 or not training:
        return residual + x
    assert 0.0 < drop_prob < 1.0, drop_prob
    keep_prob = 1.0 - drop_prob
    if key is None:
        key = jax.random.PRNGKey(seed)

    B = x.shape[0]
    N = int(np.prod(x.shape[1:])) if x.ndim > 1 else 1
    scale = _keep_scale(key, B, drop_prob, keep_prob)
    out = _launch(_drop_path_add_kernel, scale,
                  [x.reshape(B, N), residual.reshape(B, N)], residual.dtype,
                  max_tb, max_block_bytes)
    return out.reshape(x.shape)


class DropPathPallas:
    """Mirror of the PyTorch DropPath module (forward only)."""

    def __init__(self, drop_prob=None):
        # PyTorch's module with drop_prob=None would crash in training mode;
        # treat None as 0.0 (identity) instead.
        self.drop_prob = drop_prob
        self.training = True

    def __call__(self, x, *, key=None, seed: int = 0):
        p = 0.0 if self.drop_prob is None else float(self.drop_prob)
        return drop_path_pallas(x, p, key=key, seed=seed, training=self.training)


# -------------------------------- test --------------------------------------


if __name__ == "__main__":
    root = jax.random.PRNGKey(0)
    kx, kmask, kx2, kmask2, kres = jax.random.split(root, 5)

    B, C, H, W = 8, 4, 16, 16
    x = jax.random.normal(kx, (B, C, H, W), dtype=jnp.float32)

    drop_prob = 0.25
    keep_prob = 1.0 - drop_prob

    module = DropPathPallas(drop_prob)

    # --- training mode: stochastic depth (Pallas kernel path) ---
    module.training = True
    y = module(x, key=kmask)
    jax.block_until_ready(y)
    assert y.shape == x.shape

    y2 = np.asarray(y.reshape(B, -1))
    x2 = np.asarray(x.reshape(B, -1))
    for b in range(B):
        if np.any(y2[b] != 0.0):
            np.testing.assert_allclose(y2[b], x2[b] / keep_prob, rtol=1e-6, atol=1e-6)
        else:
            assert np.all(y2[b] == 0.0)

    # determinism: same key -> same per-sample mask
    y_again = module(x, key=kmask)
    jax.block_until_ready(y_again)
    np.testing.assert_array_equal(np.asarray(y), np.asarray(y_again))

    # --- eval mode: identity (matches PyTorch forward) ---
    module.training = False
    np.testing.assert_array_equal(np.asarray(module(x, key=kmask)), np.asarray(x))

    # --- drop_prob == 0: identity even in training mode ---
    module0 = DropPathPallas(0.0)
    module0.training = True
    np.testing.assert_array_equal(np.asarray(module0(x)), np.asarray(x))

    # --- multi-tile grid exercise (small caps force a 2x4 grid) ---
    xb = jax.random.normal(kx2, (16, 2048), dtype=jnp.float32)
    yb = drop_path_pallas(xb, 0.3, key=kmask2, training=True,
                          max_tb=8, max_block_bytes=8 * 512 * 4)
    jax.block_until_ready(yb)
    scale_ref = np.asarray(_keep_scale(kmask2, 16, 0.3, 0.7))
    np.testing.assert_allclose(np.asarray(yb), np.asarray(xb) * scale_ref,
                               rtol=1e-6, atol=1e-6)

    # --- fused residual-add variant ---
    res = jax.random.normal(kres, (B, C, H, W), dtype=jnp.float32)
    yf = drop_path_add_pallas(res, x, drop_prob, key=kmask, training=True)
    jax.block_until_ready(yf)
    scale_main = np.asarray(_keep_scale(kmask, B, drop_prob, keep_prob))
    ref_f = np.asarray(res) + np.asarray(x) * scale_main.reshape(B, 1, 1, 1)
    np.testing.assert_allclose(np.asarray(yf), ref_f, rtol=1e-5, atol=1e-5)
    # eval mode of fused variant: residual + x
    np.testing.assert_allclose(
        np.asarray(drop_path_add_pallas(res, x, drop_prob, key=kmask, training=False)),
        np.asarray(res) + np.asarray(x), rtol=1e-6, atol=1e-6)

    print("KERNEL_OK")
</pallas_src>

<mosaic_0001>
module attributes {stable_mosaic.version = 11 : i64} {
  func.func @_drop_path_kernel(%arg0: i32, %arg1: i32, %arg2: memref<8x1xf32, #tpu.memory_space<vmem>>, %arg3: memref<8x1024xf32, #tpu.memory_space<vmem>>, %arg4: memref<8x1024xf32, #tpu.memory_space<vmem>>) attributes {dimension_semantics = [#tpu.dimension_semantics<parallel>, #tpu.dimension_semantics<parallel>], iteration_bounds = array<i64: 1, 1>, scalar_prefetch = 0 : i64, scratch_operands = 0 : i64, tpu.core_type = #tpu.core_type<tc>, window_params = [{transform_indices = @transform_0, window_bounds = array<i64: 8, 1>}, {transform_indices = @transform_1, window_bounds = array<i64: 8, 1024>}, {transform_indices = @transform_2, window_bounds = array<i64: 8, 1024>}]} {
    %c0 = arith.constant 0 : index
    %c0_0 = arith.constant 0 : index
    %0 = vector.load %arg3[%c0, %c0_0] : memref<8x1024xf32, #tpu.memory_space<vmem>>, vector<8x1024xf32>
    %c0_1 = arith.constant 0 : index
    %c0_2 = arith.constant 0 : index
    %1 = vector.load %arg2[%c0_1, %c0_2] : memref<8x1xf32, #tpu.memory_space<vmem>>, vector<8x1xf32>
    %2 = vector.broadcast %1 : vector<8x1xf32> to vector<8x1024xf32>
    %3 = arith.mulf %0, %2 : vector<8x1024xf32>
    %c0_3 = arith.constant 0 : index
    %c0_4 = arith.constant 0 : index
    %4 = vector.load %arg4[%c0_3, %c0_4] : memref<8x1024xf32, #tpu.memory_space<vmem>>, vector<8x1024xf32>
    tpu.vector_store %arg4[%c0_3, %c0_4], %3 {strides = array<i32>} : memref<8x1024xf32, #tpu.memory_space<vmem>>, vector<8x1024xf32>,
    return
  }
  func.func @transform_0(%arg0: i32, %arg1: i32) -> (i32, i32) {
    %c0_i32 = arith.constant 0 : i32
    %c0_i32_0 = arith.constant 0 : i32
    return %arg0, %c0_i32 : i32, i32
  }
  func.func @transform_1(%arg0: i32, %arg1: i32) -> (i32, i32) {
    %c0_i32 = arith.constant 0 : i32
    return %arg0, %arg1 : i32, i32
  }
  func.func @transform_2(%arg0: i32, %arg1: i32) -> (i32, i32) {
    %c0_i32 = arith.constant 0 : i32
    return %arg0, %arg1 : i32, i32
  }
}

</mosaic_0001>

<bundles_post_ra>
// kernel: tpu_custom_call.1
= control target key start
LH: loop header
LB: loop body
LE: loop exit
PB: predicated region body
PF: predicated region fallthrough
CT: control target
= control target key end

     0   :  { %7 = vsyncpa [#allocation3], 0  ;;  %s166_s0 = inlined_call_operand.vmem [shape: f32[8,1], index: 0, kind: input, shape index: {}]   ;;  %s167_s1 = inlined_call_operand.hbm [shape: f32[8,1024], index: 1, kind: input, shape index: {}]   ;;  %s168_s2 = inlined_call_operand.hbm [shape: f32[8,1024], index: 2, kind: output, shape index: {}]  }
   0x1   :  { %8 = vsyncpa [#allocation4], 0  ;;  %s121_s9 = smov [#allocation2]   ;;  %s73_s13 = scalar_lea.hbm %s167_s1, 1024 }
   0x2   :  { %s17_s10 = sshll.u32 %s121_s9, 4  ;;  %p74_p0 = scmp.ne.s32.totalorder %s167_s1, %s73_s13  ;;  %s18_s10 = int_to_ptr.vmem [resolvable:$true] %s17_s10 }
   0x3   :  { %p77_p1 = scmp.lt.u32.totalorder %s73_s13, %s167_s1 }
   0x5   :  { %p79_p2 = pnand %p77_p1, %p74_p0 }
   0x7   :  { %82 = shalt.err (!%p79_p2)
}
   0x8   :  { %s83_s18 = scalar_lea.vmem %s18_s10, 1024  ;;  %p88_p4 = scmp.lt.s32.totalorder %s18_s10, %s18_s10 }
   0x9   :  { %p84_p3 = scmp.ne.s32.totalorder %s18_s10, %s83_s18  ;;  %p89_p5 = scmp.lt.s32.totalorder %s83_s18, %s83_s18 }
   0xb   :  { %p90_p6 = por %p89_p5, %p88_p4 }
   0xd   :  { %p91_p7 = pnand %p90_p6, %p84_p3 }
   0xf   :  { %94 = shalt.err (!%p91_p7)
}
  0x10   :  { %20 = dma.hbm_to_vmem [thread:$0]  %s167_s1, 1024, %s18_s10, [#allocation3]  }
  0x11   :  { %117 = dma.done.wait [#allocation3], 1024  }
  0x12   :  { %118 = vsyncadd [#allocation3], 4294966272  ;;  %v122_v0 = vmov 0   ;;  %v32_v1 = vld [vmem:[%s166_s0] sm:$0xff]  ;;  %v25_v3 = vld [vmem:[#allocation2 + $0x8] sm:$0xff]  ;;  %s123_s23 = smov [#allocation5]  }
  0x13   :  { %72 = vset.pattern.permute.xlu0 %v122_v0  ;;  %v24_v2 = vld [vmem:[#allocation2] sm:$0xff]  ;;  %v26_v4 = vld [vmem:[#allocation2 + $0x10] sm:$0xff]  ;;  %v27_v5 = vld [vmem:[#allocation2 + $0x18] sm:$0xff]  ;;  %s60_s24 = sshll.u32 %s123_s23, 4  ;;  %s61_s24 = int_to_ptr.vmem [resolvable:$true] %s60_s24 }
  0x14   :  { %35 = vperm.xlu0 %72, %v32_v1   ;;  %v28_v6 = vld [vmem:[#allocation2 + $0x20] sm:$0xff]  ;;  %v29_v7 = vld [vmem:[#allocation2 + $0x28] sm:$0xff]  ;;  %v30_v8 = vld [vmem:[#allocation2 + $0x30] sm:$0xff]  ;;  %s95_s0 = scalar_lea.vmem %s61_s24, 1024  ;;  %p100_p9 = scmp.lt.s32.totalorder %s61_s24, %s61_s24 }
  0x15   :  { %v31_v9 = vld [vmem:[#allocation2 + $0x38] sm:$0xff]  ;;  %p96_p8 = scmp.ne.s32.totalorder %s61_s24, %s95_s0  ;;  %p101_p10 = scmp.lt.s32.totalorder %s95_s0, %s95_s0 }
  0x17   :  { %p102_p11 = por %p101_p10, %p100_p9 }
  0x19   :  { %p103_p12 = pnand %p102_p11, %p96_p8 }
  0x93   :  { %v36_v10 = vpop.permute.xlu0 %35 }
  0x94   :  { %v38_v11 = vmul.f32 %v36_v10, %v24_v2  ;;  %v39_v12 = vmul.f32 %v36_v10, %v25_v3  ;;  %v40_v13 = vmul.f32 %v36_v10, %v26_v4  ;;  %v41_v14 = vmul.f32 %v36_v10, %v27_v5 }
  0x95   :  { %v42_v15 = vmul.f32 %v36_v10, %v28_v6  ;;  %v43_v16 = vmul.f32 %v36_v10, %v29_v7  ;;  %v44_v17 = vmul.f32 %v36_v10, %v30_v8  ;;  %v45_v18 = vmul.f32 %v36_v10, %v31_v9 }
  0x96   :  { %46 = vst [vmem:[#allocation5] sm:$0xff] %v38_v11  ;;  %47 = vst [vmem:[#allocation5 + $0x8] sm:$0xff] %v39_v12 }
  0x97   :  { %48 = vst [vmem:[#allocation5 + $0x10] sm:$0xff] %v40_v13  ;;  %49 = vst [vmem:[#allocation5 + $0x18] sm:$0xff] %v41_v14 }
  0x98   :  { %50 = vst [vmem:[#allocation5 + $0x20] sm:$0xff] %v42_v15  ;;  %51 = vst [vmem:[#allocation5 + $0x28] sm:$0xff] %v43_v16 }
  0x99   :  { %52 = vst [vmem:[#allocation5 + $0x30] sm:$0xff] %v44_v17  ;;  %53 = vst [vmem:[#allocation5 + $0x38] sm:$0xff] %v45_v18 }
  0x9a   :  { %106 = shalt.err (!%p103_p12)
}
  0x9b   :  { %s107_s26 = scalar_lea.hbm %s168_s2, 1024 }
  0x9c   :  { %p108_p13 = scmp.ne.s32.totalorder %s168_s2, %s107_s26  ;;  %p111_p0 = scmp.lt.u32.totalorder %s107_s26, %s168_s2 }
  0x9e   :  { %p113_p1 = pnand %p111_p0, %p108_p13 }
  0xa0   :  { %116 = shalt.err (!%p113_p1)
}
  0xa1   :  { %63 = dma.vmem_to_hbm [thread:$0]  %s61_s24, 1024, %s168_s2, [#allocation4]  }
  0xa2   :  { %119 = dma.done.wait [#allocation4], 1024  }
  0xa3   :  { %120 = vsyncadd [#allocation4], 4294966272 }
  0xa4   :  { %67 = vsyncpa [#allocation3], 1 }
  0xa5   :  { %68 = vsyncpa [#allocation4], 1 }

</bundles_post_ra>
